<compile_context>
chip_gen: v7x
topology: tpu7x:2x2x1
jax: 0.10.0
libtpu: 0.0.40
codegen_flags: <defaults>
</compile_context>

<pallas_src>
import functools
from typing import NamedTuple

import jax
import jax.numpy as jnp
from jax.experimental import pallas as pl
from jax.experimental.pallas import tpu as pltpu


def _round_up(v, m):
    return ((v + m - 1) // m) * m


class HighwayConfig(NamedTuple):
    hidden: int   # logical hidden size
    hp: int       # padded hidden (multiple of 128, lane-dense)
    bn: int       # output-column tile; == hp when the fused weight is VMEM-resident


def prepare_highway_params(w1, b1, w2, b2, *, matmul_dtype=None,
                           resident_weight_bytes=24 << 20,
                           weight_block_bytes=8 << 20):
    """One-time fusion + padding of the two Linear layers.

    w1/w2 are stored (in, out) so y = x @ w + b  (i.e. torch_weight.T).
    Returns (w_f, b_f, cfg).  w_f is column-block interleaved: block j holds
    [W1[:, j*bn:(j+1)*bn] | W2[:, j*bn:(j+1)*bn]] so one MXU matmul per tile
    produces both the H branch and the T gate.  Call once per parameter set.
    """
    hidden = w1.shape[0]
    hp = _round_up(max(hidden, 128), 128)
    w_dtype = jnp.dtype(matmul_dtype) if matmul_dtype is not None else jnp.dtype(w1.dtype)
    ws = w_dtype.itemsize

    # Keep the whole fused weight VMEM-resident when it is small enough
    # (fits v7x's 64 MiB/TC with headroom); otherwise stream (Hp, 2*bn) blocks.
    if 2 * hp * hp * ws <= resident_weight_bytes:
        bn = hp
    else:
        bn = 128
        for mult in range(hp // 128, 0, -1):
            cand = 128 * mult
            if hp % cand == 0 and hp * 2 * cand * ws <= weight_block_bytes:
                bn = cand
                break
    grid_n = hp // bn

    def pad2(w):
        return jnp.zeros((hp, hp), w_dtype).at[:hidden, :hidden].set(w.astype(w_dtype))

    def pad1(b):
        return jnp.zeros((hp,), jnp.float32).at[:hidden].set(b.astype(jnp.float32))

    w1p, w2p = pad2(w1), pad2(w2)
    b1p, b2p = pad1(b1), pad1(b2)

    # Column-block interleave -> shape (hp, 2*hp); block j = cols [2*j*bn, 2*(j+1)*bn).
    w_f = jnp.stack([w1p.reshape(hp, grid_n, bn),
                     w2p.reshape(hp, grid_n, bn)], axis=2).reshape(hp, 2 * hp)
    b_f = jnp.stack([b1p.reshape(grid_n, bn),
                     b2p.reshape(grid_n, bn)], axis=1).reshape(1, 2 * hp)
    return w_f, b_f, HighwayConfig(hidden, hp, bn)


def _highway_kernel(x_ref, w_ref, b_ref, o_ref, *, n_axis):
    bn = o_ref.shape[-1]
    x = x_ref[...]
    # Single fused MXU matmul -> both branches, f32 accumulation.  Matmul dtype
    # is explicit (= fused-weight dtype).
    y = jnp.dot(x.astype(w_ref.dtype), w_ref[...],
                preferred_element_type=jnp.float32)
    y = y + b_ref[...]                       # bias stored as f32
    h = jnp.maximum(y[:, :bn], 0.0)          # relu(ff1)
    t = jax.nn.sigmoid(y[:, bn:])            # sigmoid(ff2)

    if n_axis is None:                       # resident W: skip path uses whole tile
        x_skip = x
    else:                                    # streamed W: slice the N-block columns
        j = pl.program_id(n_axis)
        start = pl.multiple_of(j * bn, 128)
        x_skip = x_ref[:, pl.ds(start, bn)]

    xf = x_skip.astype(jnp.float32)
    o_ref[...] = (h * t + xf * (1.0 - t)).astype(o_ref.dtype)


def _choose_bm(m, sublane, block_m):
    """Pick the M tile.  Prefer a divisor of m (no pad / slice HBM copies) that
    also gives >= 2 grid steps (v7x megacore); otherwise pad m up to bm."""
    target = min(_round_up(block_m, sublane), _round_up(m, sublane))
    if m % sublane == 0:
        divisors = [bm for bm in range(target, sublane - 1, -sublane) if m % bm == 0]
        for bm in divisors:
            if m // bm >= 2 and bm * 4 >= target:
                return bm, m
        if divisors and divisors[0] * 4 >= target:
            return divisors[0], m
    bm = target
    return bm, _round_up(m, bm)


def _vmem_limit_bytes(bm, hp, bn, x_dtype, w_dtype, resident):
    xs = jnp.dtype(x_dtype).itemsize
    ws = jnp.dtype(w_dtype).itemsize
    x_buf = 2 * bm * hp * xs                   # double-buffered x tiles
    out_buf = 2 * bm * bn * xs                 # double-buffered out tiles
    if resident:
        w_buf = hp * 2 * hp * ws               # Buffered(1): single resident copy
        b_buf = 2 * hp * 4
    else:
        w_buf = 2 * hp * 2 * bn * ws           # streamed, double-buffered
        b_buf = 2 * 2 * bn * 4
    interm = 3 * bm * 2 * bn * 4               # f32 y + elementwise temporaries
    need = x_buf + out_buf + w_buf + b_buf + interm
    return min(max(int(need * 1.25) + (4 << 20), 32 << 20), 128 << 20)


@functools.partial(jax.jit, static_argnames=("cfg", "block_m"))
def highway_feed_forward(x, w_f, b_f, *, cfg, block_m=512):
    """Eval-mode Highway forward: relu(xW1+b1)*t + x*(1-t), t = sigmoid(xW2+b2).

    block_m: 512 is a good default on v6e/v7x; 128-256 is enough on v5e.
    """
    hidden, hp, bn = cfg
    orig_shape = x.shape
    x2d = x.reshape(-1, hidden)
    m = x2d.shape[0]

    sublane = max(8, 32 // jnp.dtype(x.dtype).itemsize)   # 8 f32 / 16 bf16 / 32 int8
    bm, mp = _choose_bm(m, sublane, block_m)
    grid_m = mp // bm
    grid_n = hp // bn
    resident = grid_n == 1

    # Fast path: avoid the pad copy / output slice when shapes already line up.
    if mp != m or hp != hidden:
        x_in = jnp.pad(x2d, ((0, mp - m), (0, hp - hidden)))
    else:
        x_in = x2d

    if resident:
        grid = (grid_m,)
        in_specs = [
            pl.BlockSpec((bm, hp), lambda i: (i, 0)),                # x tile (streamed)
            pl.BlockSpec((hp, 2 * hp), lambda i: (0, 0),
                         pipeline_mode=pl.Buffered(1)),              # fused W, single buffer
            pl.BlockSpec((1, 2 * hp), lambda i: (0, 0),
                         pipeline_mode=pl.Buffered(1)),              # fused bias
        ]
        out_specs = pl.BlockSpec((bm, hp), lambda i: (i, 0))
        dims = ("parallel",)
        kernel = functools.partial(_highway_kernel, n_axis=None)
    else:
        # Large hidden: stream fused W in (hp, 2*bn) column blocks; N outermost
        # so each W block is fetched from HBM exactly once.
        grid = (grid_n, grid_m)
        in_specs = [
            pl.BlockSpec((bm, hp), lambda j, i: (i, 0)),
            pl.BlockSpec((hp, 2 * bn), lambda j, i: (0, j)),
            pl.BlockSpec((1, 2 * bn), lambda j, i: (0, j)),
        ]
        out_specs = pl.BlockSpec((bm, bn), lambda j, i: (i, j))
        dims = ("arbitrary", "arbitrary")
        kernel = functools.partial(_highway_kernel, n_axis=0)

    xs = jnp.dtype(x.dtype).itemsize
    ws = jnp.dtype(w_f.dtype).itemsize
    cost = pl.CostEstimate(
        flops=2 * mp * hp * (2 * hp) + 6 * mp * hp,
        transcendentals=mp * hp,                                  # sigmoid
        bytes_accessed=(mp * hp * xs * (1 if resident else grid_n)   # x reads
                        + 2 * hp * hp * ws + 2 * hp * 4              # W, b
                        + mp * hp * xs),                             # out
    )

    out = pl.pallas_call(
        kernel,
        out_shape=jax.ShapeDtypeStruct((mp, hp), x.dtype),
        grid_spec=pltpu.PrefetchScalarGridSpec(
            num_scalar_prefetch=0,
            grid=grid,
            in_specs=in_specs,
            out_specs=out_specs,
        ),
        compiler_params=pltpu.CompilerParams(
            dimension_semantics=dims,
            vmem_limit_bytes=_vmem_limit_bytes(bm, hp, bn, x.dtype, w_f.dtype, resident),
        ),
        cost_estimate=cost,
    )(x_in, w_f, b_f)

    if mp != m or hp != hidden:
        out = out[:m, :hidden]
    return out.reshape(orig_shape)


def _init_linear_params(key, hidden):
    """Deterministic init mimicking torch.nn.Linear default (uniform +/- 1/sqrt(H))."""
    kw, kb = jax.random.split(key)
    bound = 1.0 / (hidden ** 0.5)
    # Stored as [in, out] so the kernel does x @ W (== x @ torch_W.T).
    w = jax.random.uniform(kw, (hidden, hidden), jnp.float32, -bound, bound)
    b = jax.random.uniform(kb, (hidden,), jnp.float32, -bound, bound)
    return w, b


def _reference(x, w1, b1, w2, b2):
    h = jax.nn.relu(x @ w1 + b1)
    t = jax.nn.sigmoid(x @ w2 + b2)
    return h * t + x * (1.0 - t)


if __name__ == "__main__":
    key = jax.random.PRNGKey(0)

    # --- resident-weight path at the module's natural small shape ----------
    hidden = 32
    batch, seq = 2, 8
    kx, k1, k2, k3 = jax.random.split(key, 4)
    x = jax.random.normal(kx, (batch, seq, hidden), jnp.float32)
    w1, b1 = _init_linear_params(k1, hidden)
    w2, b2 = _init_linear_params(k2, hidden)

    w_f, b_f, cfg = prepare_highway_params(w1, b1, w2, b2)   # one-time fusion
    out = jax.block_until_ready(highway_feed_forward(x, w_f, b_f, cfg=cfg))

    ref = _reference(x, w1, b1, w2, b2)
    assert out.shape == x.shape and out.dtype == x.dtype
    assert jnp.allclose(out, ref, atol=1e-5, rtol=1e-5), "mismatch (resident path)"

    # --- also exercise the streamed-weight path (large-H / v7x regime) -----
    hidden2 = 256
    kx2, k4, k5 = jax.random.split(k3, 3)
    x2 = jax.random.normal(kx2, (batch, seq, hidden2), jnp.float32)
    w1b, b1b = _init_linear_params(k4, hidden2)
    w2b, b2b = _init_linear_params(k5, hidden2)
    w_f2, b_f2, cfg2 = prepare_highway_params(
        w1b, b1b, w2b, b2b,
        resident_weight_bytes=0, weight_block_bytes=300_000)   # force bn=128 streaming
    assert cfg2.bn == 128 and cfg2.hp == 256
    out2 = jax.block_until_ready(highway_feed_forward(x2, w_f2, b_f2, cfg=cfg2))
    ref2 = _reference(x2, w1b, b1b, w2b, b2b)
    assert jnp.allclose(out2, ref2, atol=1e-4, rtol=1e-4), "mismatch (streamed path)"

    print("KERNEL_OK")
</pallas_src>

<mosaic_0001>
module attributes {stable_mosaic.version = 11 : i64} {
  func.func @_highway_kernel(%arg0: i32, %arg1: memref<8x128xf32, #tpu.memory_space<vmem>>, %arg2: memref<128x256xf32, #tpu.memory_space<vmem>>, %arg3: memref<1x256xf32, #tpu.memory_space<vmem>>, %arg4: memref<8x128xf32, #tpu.memory_space<vmem>>) attributes {dimension_semantics = [#tpu.dimension_semantics<parallel>], iteration_bounds = array<i64: 2>, scalar_prefetch = 0 : i64, scratch_operands = 0 : i64, tpu.core_type = #tpu.core_type<tc>, window_params = [{transform_indices = @transform_0, window_bounds = array<i64: 8, 128>}, {pipeline_mode = #tpu.pipeline_mode<synchronous>, transform_indices = @transform_1, window_bounds = array<i64: 128, 256>}, {pipeline_mode = #tpu.pipeline_mode<synchronous>, transform_indices = @transform_2, window_bounds = array<i64: 1, 256>}, {transform_indices = @transform_3, window_bounds = array<i64: 8, 128>}]} {
    %c0 = arith.constant 0 : index
    %c0_0 = arith.constant 0 : index
    %0 = vector.load %arg1[%c0, %c0_0] : memref<8x128xf32, #tpu.memory_space<vmem>>, vector<8x128xf32>
    %c0_1 = arith.constant 0 : index
    %c0_2 = arith.constant 0 : index
    %1 = vector.load %arg2[%c0_1, %c0_2] : memref<128x256xf32, #tpu.memory_space<vmem>>, vector<128x256xf32>
    %cst = arith.constant dense<0.000000e+00> : vector<8x256xf32>
    %2 = tpu.matmul %0, %1, %cst {dimension_numbers = #tpu.dot_dimension_numbers<[1], [0], [0], [1], [0, 0, 1, 1], [], []>} : vector<8x128xf32>, vector<128x256xf32>, vector<8x256xf32> -> vector<8x256xf32>
    %c0_3 = arith.constant 0 : index
    %c0_4 = arith.constant 0 : index
    %3 = vector.load %arg3[%c0_3, %c0_4] : memref<1x256xf32, #tpu.memory_space<vmem>>, vector<1x256xf32>
    %4 = vector.broadcast %3 : vector<1x256xf32> to vector<8x256xf32>
    %5 = arith.addf %2, %4 : vector<8x256xf32>
    %6 = vector.extract_strided_slice %5 {offsets = [0, 0], sizes = [8, 128], strides = [1, 1]} : vector<8x256xf32> to vector<8x128xf32>
    %cst_5 = arith.constant 0.000000e+00 : f32
    %7 = vector.broadcast %cst_5 : f32 to vector<8x128xf32>
    %8 = arith.maximumf %6, %7 : vector<8x128xf32>
    %9 = vector.extract_strided_slice %5 {offsets = [0, 128], sizes = [8, 128], strides = [1, 1]} : vector<8x256xf32> to vector<8x128xf32>
    %10 = arith.negf %9 : vector<8x128xf32>
    %11 = math.exp %10 : vector<8x128xf32>
    %cst_6 = arith.constant 1.000000e+00 : f32
    %12 = vector.broadcast %cst_6 : f32 to vector<8x128xf32>
    %13 = arith.addf %12, %11 : vector<8x128xf32>
    %14 = arith.divf %12, %13 : vector<8x128xf32>
    %15 = arith.mulf %8, %14 : vector<8x128xf32>
    %cst_7 = arith.constant 1.000000e+00 : f32
    %16 = vector.broadcast %cst_7 : f32 to vector<8x128xf32>
    %17 = arith.subf %16, %14 : vector<8x128xf32>
    %18 = arith.mulf %0, %17 : vector<8x128xf32>
    %19 = arith.addf %15, %18 : vector<8x128xf32>
    %c0_8 = arith.constant 0 : index
    %c0_9 = arith.constant 0 : index
    %20 = vector.load %arg4[%c0_8, %c0_9] : memref<8x128xf32, #tpu.memory_space<vmem>>, vector<8x128xf32>
    tpu.vector_store %arg4[%c0_8, %c0_9], %19 {strides = array<i32>} : memref<8x128xf32, #tpu.memory_space<vmem>>, vector<8x128xf32>,
    return
  }
  func.func @transform_0(%arg0: i32) -> (i32, i32) {
    %c0_i32 = arith.constant 0 : i32
    %c0_i32_0 = arith.constant 0 : i32
    return %arg0, %c0_i32 : i32, i32
  }
  func.func @transform_1(%arg0: i32) -> (i32, i32) {
    %c0_i32 = arith.constant 0 : i32
    %c0_i32_0 = arith.constant 0 : i32
    %c0_i32_1 = arith.constant 0 : i32
    return %c0_i32, %c0_i32_0 : i32, i32
  }
  func.func @transform_2(%arg0: i32) -> (i32, i32) {
    %c0_i32 = arith.constant 0 : i32
    %c0_i32_0 = arith.constant 0 : i32
    %c0_i32_1 = arith.constant 0 : i32
    return %c0_i32, %c0_i32_0 : i32, i32
  }
  func.func @transform_3(%arg0: i32) -> (i32, i32) {
    %c0_i32 = arith.constant 0 : i32
    %c0_i32_0 = arith.constant 0 : i32
    return %arg0, %c0_i32 : i32, i32
  }
}

</mosaic_0001>

<bundles_post_ra>
// kernel: highway_feed_forward.1
= control target key start
LH: loop header
LB: loop body
LE: loop exit
PB: predicated region body
PF: predicated region fallthrough
CT: control target
= control target key end

     0   :  { %8 = vsyncpa [#allocation3], 0  ;;  %s508_s12 = smov 0   ;;  %s574_s0 = inlined_call_operand.vmem [shape: f32[16,128], index: 0, kind: input, shape index: {}]   ;;  %s575_s1 = inlined_call_operand.hbm [shape: f32[128,256], index: 1, kind: input, shape index: {}]   ;;  %s576_s2 = inlined_call_operand.vmem [shape: f32[1,256], index: 2, kind: input, shape index: {}]   ;;  %s577_s3 = inlined_call_operand.vmem [shape: f32[16,128], index: 3, kind: output, shape index: {}]  }
   0x1 LB: > { %s514_s13 = sadd.s32 4294967295, %s482_s12   ;;  %p376_p0 = scmp.ge.s32.totalorder %s482_s12, 1  ;;  %s482_s12 = sphi %s508_s12, %s14_s12  }
   0x2   : > { %p113_p1 = scmp.lt.s32.totalorder %s482_s12, 3  ;;  %s484_s14 = smov [#allocation2]  }
   0x3   : > { %s125_s15 = sshll.u32 %s484_s14, 4  ;;  %p578_p3 = scmp.eq.s32.totalorder %s514_s13, 0  ;;  %s126_s15 = int_to_ptr.vmem [resolvable:$true] %s125_s15 }
   0x4   : > { %p518_p2 = pnand %p376_p0, %p113_p1  ;;  %s444_s20 = scalar_lea.hbm %s575_s1, 4096 }
   0x5   : > { %p445_p6 = scmp.ne.s32.totalorder %s575_s1, %s444_s20  ;;  %p451_p10 = scmp.lt.u32.totalorder %s444_s20, %s575_s1 }
   0x6   : > { %s580_s16 = scalar_select %p518_p2, 1, 0 }
   0x7   : > { %p422_p4 = pneg %p518_p2 }
   0x9   : > { %p527_p5 = pnand %p578_p3, %p422_p4 }
   0xb   : > { %p446_p7 = pneg %p527_p5 }
   0xd   : > { %p447_p8 = pnand %p446_p7, %p445_p6 }
   0xf   : > { %p448_p9 = pneg %p447_p8 }
  0x11   : > { %p453_p11 = pnand %p451_p10, %p448_p9 }
  0x13   : > { %456 = shalt.err (!%p453_p11)
}
  0x14   : > { %s457_s25 = scalar_lea.vmem %s126_s15, 4096  ;;  %p465_p1 = scmp.lt.s32.totalorder %s126_s15, %s126_s15 }
  0x15   : > { %p458_p12 = scmp.ne.s32.totalorder %s126_s15, %s457_s25  ;;  %p466_p4 = scmp.lt.s32.totalorder %s457_s25, %s457_s25 }
  0x17   : > { %p460_p13 = pnand %p458_p12, %p446_p7  ;;  %p467_p3 = por %p466_p4, %p465_p1 }
  0x19   : > { %p461_p0 = pneg %p460_p13 }
  0x1b   : > { %p468_p2 = pnand %p467_p3, %p461_p0 }
  0x1d   : > { %471 = shalt.err (!%p468_p2)
}
  0x1e   : > { %s485_s26 = smov 256   ;;  %s486_s27 = smov 16  }
  0x1f   : > { %425 = dma.hbm_to_vmem [thread:$0]  (!%p527_p5), %s575_s1, 4096, %s126_s15, [#allocation3], %s485_s26, %s485_s26, %s486_s27  }
  0x20   : > { %p582_p6 = scmp.ne.s32.totalorder %s580_s16, 0 }
  0x21   : > { %p583_p8 = scmp.eq.s32.totalorder (!%p582_p6), %s514_s13, 0 }
  0x22   : > { %151 = sbr.rel (%p582_p6) target bundleno = 325 (0x145), region = 32 }
  0x29   : > { %477 = dma.done.wait (%p583_p8), [#allocation3], 4096   ;;  %p584_p7 = pmov %p583_p8 }
  0x2a   : > { %v487_v0 = vmov 0.0   ;;  %v183_v1 = vld [vmem:[#allocation2 + $0x8] sm:$0xff]  ;;  %v185_v2 = vld [vmem:[#allocation2 + $0x18] sm:$0xff]  ;;  %v182_v3 = vld [vmem:[#allocation2] sm:$0xff]  ;;  %p173_p2 = scmp.lt.s32.totalorder %s514_s13, 1  ;;  %v216_v50 = vlaneseq }
  0x2b   : > { %479 = vsyncadd (%p584_p7), [#allocation3], 4294963200  ;;  %290 = vmatprep.mubr.f32.mxu0 %v487_v0  ;;  %v386_v4 = vpack.c.bf16 %v185_v2, %v183_v1  ;;  %v184_v5 = vld [vmem:[#allocation2 + $0x10] sm:$0xff]  ;;  %v187_v6 = vld [vmem:[#allocation2 + $0x28] sm:$0xff] }
  0x2c   : > { %v189_v7 = vld [vmem:[#allocation2 + $0x38] sm:$0xff]  ;;  %v388_v8 = vpack.c.bf16 %v184_v5, %v182_v3  ;;  %v186_v10 = vld [vmem:[#allocation2 + $0x20] sm:$0xff]  ;;  %v188_v11 = vld [vmem:[#allocation2 + $0x30] sm:$0xff]  ;;  %s586_s13 = smov (!%p173_p2, %s514_s13), 1  ;;  %v217_v51 = vshrl.u32 %v216_v50, 7 }
  0x2d   : > { %v390_v9 = vpack.c.bf16 %v189_v7, %v187_v6  ;;  %v191_v12 = vld [vmem:[#allocation2 + $0x48] sm:$0xff]  ;;  %387 = vmatprep.subr.bf16.mxu0 %v386_v4  ;;  %v193_v13 = vld [vmem:[#allocation2 + $0x58] sm:$0xff]  ;;  %v392_v14 = vpack.c.bf16 %v188_v11, %v186_v10  ;;  %v190_v16 = vld [vmem:[#allocation2 + $0x40] sm:$0xff]  ;;  %s381_s30 = sshll.u32 %s586_s13, 3 }
  0x2e   : > { %389 = vmatpush1.bf16.msra.mxu0 %v388_v8  ;;  %v394_v15 = vpack.c.bf16 %v193_v13, %v191_v12  ;;  %v192_v17 = vld [vmem:[#allocation2 + $0x50] sm:$0xff]  ;;  %v195_v18 = vld [vmem:[#allocation2 + $0x68] sm:$0xff]  ;;  %v197_v19 = vld [vmem:[#allocation2 + $0x78] sm:$0xff]  ;;  %s176_s6 = scalar_lea.vmem %s574_s0, %s381_s30  ;;  %v222_v52 = vsub.s32 1, %v217_v51  ;;  %v218_v60 = vsub.s32 0, %v217_v51  ;;  %s180_s11 = scalar_lea.vmem %s577_s3, %s381_s30 }
  0x2f   : > { %391 = vmatprep.subr.bf16.mxu0 %v390_v9  ;;  %v396_v20 = vpack.c.bf16 %v192_v17, %v190_v16  ;;  %v398_v21 = vpack.c.bf16 %v197_v19, %v195_v18  ;;  %v194_v22 = vld [vmem:[#allocation2 + $0x60] sm:$0xff]  ;;  %v196_v23 = vld [vmem:[#allocation2 + $0x70] sm:$0xff]  ;;  %v199_v24 = vld [vmem:[#allocation2 + $0x88] sm:$0xff] }
  0x30   : > { %v201_v25 = vld [vmem:[#allocation2 + $0x98] sm:$0xff]  ;;  %v400_v26 = vpack.c.bf16 %v196_v23, %v194_v22  ;;  %v198_v28 = vld [vmem:[#allocation2 + $0x80] sm:$0xff]  ;;  %v200_v29 = vld [vmem:[#allocation2 + $0x90] sm:$0xff] }
  0x31   : > { %v402_v27 = vpack.c.bf16 %v201_v25, %v199_v24  ;;  %v203_v30 = vld [vmem:[#allocation2 + $0xa8] sm:$0xff]  ;;  %v205_v31 = vld [vmem:[#allocation2 + $0xb8] sm:$0xff]  ;;  %v404_v32 = vpack.c.bf16 %v200_v29, %v198_v28  ;;  %v202_v34 = vld [vmem:[#allocation2 + $0xa0] sm:$0xff] }
  0x32   : > { %393 = vmatpush1.bf16.msra.mxu0 %v392_v14  ;;  %v406_v33 = vpack.c.bf16 %v205_v31, %v203_v30  ;;  %v204_v35 = vld [vmem:[#allocation2 + $0xb0] sm:$0xff]  ;;  %v207_v36 = vld [vmem:[#allocation2 + $0xc8] sm:$0xff]  ;;  %v209_v37 = vld [vmem:[#allocation2 + $0xd8] sm:$0xff] }
  0x33   : > { %395 = vmatprep.subr.bf16.mxu0 %v394_v15  ;;  %v408_v38 = vpack.c.bf16 %v204_v35, %v202_v34  ;;  %v410_v39 = vpack.c.bf16 %v209_v37, %v207_v36  ;;  %v206_v40 = vld [vmem:[#allocation2 + $0xc0] sm:$0xff]  ;;  %v208_v41 = vld [vmem:[#allocation2 + $0xd0] sm:$0xff]  ;;  %v211_v42 = vld [vmem:[#allocation2 + $0xe8] sm:$0xff] }
  0x34   : > { %v213_v43 = vld [vmem:[#allocation2 + $0xf8] sm:$0xff]  ;;  %v412_v44 = vpack.c.bf16 %v208_v41, %v206_v40  ;;  %v210_v46 = vld [vmem:[#allocation2 + $0xe0] sm:$0xff]  ;;  %v212_v47 = vld [vmem:[#allocation2 + $0xf0] sm:$0xff] }
  0x35   : > { %v414_v45 = vpack.c.bf16 %v213_v43, %v211_v42  ;;  %v416_v48 = vpack.c.bf16 %v212_v47, %v210_v46  ;;  %v181_v49 = vld [vmem:[%s176_s6] sm:$0xff] }
  0x36   : > { %397 = vmatpush1.bf16.msra.mxu0 %v396_v20  ;;  %v214_v53 = vld [vmem:[%s576_s2] sm:$0x3] }
  0x37   : > { %399 = vmatprep.subr.bf16.mxu0 %v398_v21  ;;  %v223_v54 = vrot.slane %v214_v53, %v222_v52  ;;  %v219_v62 = vrot.slane %v214_v53, %v218_v60 }
  0x3a   : > { %401 = vmatpush1.bf16.msra.mxu0 %v400_v26 }
  0x3b   : > { %403 = vmatprep.subr.bf16.mxu0 %v402_v27 }
  0x3e   : > { %405 = vmatpush1.bf16.msra.mxu0 %v404_v32 }
  0x3f   : > { %407 = vmatprep.subr.bf16.mxu0 %v406_v33 }
  0x42   : > { %409 = vmatpush1.bf16.msra.mxu0 %v408_v38 }
  0x43   : > { %411 = vmatprep.subr.bf16.mxu0 %v410_v39 }
  0x46   : > { %413 = vmatpush1.bf16.msra.mxu0 %v412_v44 }
  0x47   : > { %415 = vmatprep.subr.bf16.mxu0 %v414_v45 }
  0x4a   : > { %417 = vmatpush1.bf16.msra.mxu0 %v416_v48 }
  0x4d   : > { %291 = vmatmul.mubr.f32.vlgmr.msra.gmra.mrb[0].mxu0 %v181_v49 }
 0x120   : > { %v292_v55 = vpop.f32.mrb[0].mxu0 }
 0x121   : > { %v294_v56 = vpop.f32.mrb[1].mxu0  ;;  %v293_v63 = vadd.f32 %v292_v55, %v219_v62 }
 0x122   : > { %v295_v57 = vadd.f32 %v294_v56, %v223_v54 }
 0x123   : > { %v297_v0 = vmax.f32 %v293_v63, 0.0 }
 0x124   : > { %v383_v58 = vmul.f32 -1.442695, %v295_v57 }
 0x126   : > { %440 = vpow2.f32 %v383_v58 }
 0x130   : > { %v441_v59 = vpop.eup %440 }
 0x131   : > { %v301_v61 = vadd.f32 1.0, %v441_v59 }
 0x133   : > { %442 = vrcp.f32 %v301_v61 }
 0x13d   : > { %v443_v1 = vpop.eup %442 }
 0x13e   : > { %v304_v2 = vmul.f32 %v443_v1, %v297_v0  ;;  %v305_v3 = vsub.f32 1.0, %v443_v1 }
 0x140   : > { %v306_v4 = vmul.f32 %v305_v3, %v181_v49 }
 0x142   : > { %v307_v5 = vadd.f32 %v306_v4, %v304_v2 }
 0x144   : > { %308 = vst [vmem:[%s180_s11] sm:$0xff] %v307_v5 }
 0x145 PF: > { %s14_s12 = sadd.s32 1, %s482_s12  }
 0x146   : > { %p11_p3 = scmp.ge.s32.totalorder %s14_s12, 4  }
 0x148   :  { %13 = sbr.rel (!%p11_p3) target bundleno = 1 (0x1), region = 67 }
 0x14f   :  { %328 = vsyncpa [#allocation3], 1 }
 0x150   :  { %330 = vsyncpa [#allocation3 + $0x1], 1 }

</bundles_post_ra>
